<compile_context>
chip_gen: v5e
topology: v5e:2x2
jax: 0.10.0
libtpu: 0.0.40
codegen_flags: <defaults>
</compile_context>

<pallas_src>
import jax
import jax.numpy as jnp
from jax.experimental import pallas as pl
from jax.experimental.pallas import tpu as pltpu


def _round_up(x: int, m: int) -> int:
    return ((x + m - 1) // m) * m


def _se_kernel(x_ref, wt_ref, b_ref, o_ref):
    # x_ref : (TM, Cp)   wt_ref : (Cp, Cp) block-diag W^T   b_ref : (1, Cp) f32
    x = x_ref[...]
    z = jnp.dot(x, wt_ref[...], preferred_element_type=jnp.float32)   # MXU
    z = z + b_ref[...]
    gate = 0.5 * jnp.tanh(0.5 * z) + 0.5           # sigmoid via single EUP tanh
    o_ref[...] = (x.astype(jnp.float32) * gate).astype(o_ref.dtype)   # VPU


def se_layer(x, weight, bias, *, min_grid_steps=4):
    """out = x * sigmoid(x @ W^T + b).  x: (..., C), weight: (C, C) [out,in], bias: (C,)."""
    orig_shape = x.shape
    C = orig_shape[-1]
    x2d = x.reshape(-1, C)
    M = x2d.shape[0]
    dtype = x.dtype
    itemsize = jnp.dtype(dtype).itemsize

    # ---- channel padding so the packed row is lane-dense (last dim = k*128) ----
    if C <= 128:
        Cd = pl.next_power_of_2(C)        # next divisor of 128
    else:
        Cd = _round_up(C, 128)
    P = 128 // Cd if Cd <= 128 else 1     # channel groups packed per 128-lane row
    Cp = P * Cd

    # ---- row padding only to a multiple of P*8 (sublane-aligned packed rows) ----
    M_pad = _round_up(M, P * 8)
    if M_pad != M or Cd != C:
        x2d = jnp.pad(x2d, ((0, M_pad - M), (0, Cd - C)))
    M_grp = M_pad // P                    # packed rows (multiple of 8)
    x_packed = x2d.reshape(M_grp, Cp)     # metadata-only reshape when no pad

    # ---- block-diagonal W^T (P copies), bias tiled; cast weight to I/O dtype ----
    if Cd != C:
        weight = jnp.pad(weight, ((0, Cd - C), (0, Cd - C)))
        bias = jnp.pad(bias, ((0, Cd - C),))
    wt_bd = jnp.kron(jnp.eye(P, dtype=weight.dtype), weight.T).astype(dtype)
    b_tiled = jnp.tile(bias.astype(jnp.float32), P).reshape(1, Cp)

    # ---- tile size: ~2 MiB / pipeline buffer, >= min_grid_steps steps, 8-aligned ----
    tm_target = max(512, min(8192, (2 * 2**20) // (Cp * itemsize)))
    TM = min(tm_target, max(8, _round_up(pl.cdiv(M_grp, min_grid_steps), 8)), M_grp)
    grid = (pl.cdiv(M_grp, TM),)          # ragged last block handled by Pallas

    # Explicit scoped-VMEM budget: double-buffered in+out tiles + resident W/b.
    need = (4 * TM * Cp * itemsize
            + 2 * Cp * Cp * jnp.dtype(wt_bd.dtype).itemsize
            + 2 * Cp * 4
            + (1 << 20))
    vmem_limit = int(min(max(need, 16 * 2**20), 32 * 2**20))

    cost = pl.CostEstimate(
        flops=2 * M_grp * Cp * Cp,
        transcendentals=M_grp * Cp,
        bytes_accessed=2 * M_grp * Cp * itemsize + (Cp * Cp + Cp) * 4,
    )

    out = pl.pallas_call(
        _se_kernel,
        out_shape=jax.ShapeDtypeStruct((M_grp, Cp), dtype),
        grid_spec=pltpu.PrefetchScalarGridSpec(
            num_scalar_prefetch=0,
            grid=grid,
            in_specs=[
                pl.BlockSpec((TM, Cp), lambda i: (i, 0)),   # streamed rows
                pl.BlockSpec((Cp, Cp), lambda i: (0, 0)),   # VMEM-resident weight
                pl.BlockSpec((1, Cp), lambda i: (0, 0)),    # VMEM-resident bias
            ],
            out_specs=pl.BlockSpec((TM, Cp), lambda i: (i, 0)),
        ),
        compiler_params=pltpu.CompilerParams(
            dimension_semantics=("parallel",),
            vmem_limit_bytes=vmem_limit),
        cost_estimate=cost,
    )(x_packed, wt_bd, b_tiled)

    out2d = out.reshape(M_pad, Cd)
    if M_pad != M or Cd != C:
        out2d = out2d[:M, :C]
    return out2d.reshape(orig_shape)


if __name__ == "__main__":
    key = jax.random.PRNGKey(0)
    k_x, k_w, k_b = jax.random.split(key, 3)

    def ref_fn(x, w, b):
        return x * jax.nn.sigmoid(jnp.einsum("...c,oc->...o", x, w) + b)

    def make_params(C, kw, kb):
        # nn.Linear(C, C) with kaiming_normal_(mode='fan_in'): std = sqrt(2 / fan_in)
        std = (2.0 / C) ** 0.5
        w = std * jax.random.normal(kw, (C, C), dtype=jnp.float32)
        bound = 1.0 / (C ** 0.5)          # PyTorch default bias init
        b = jax.random.uniform(kb, (C,), dtype=jnp.float32, minval=-bound, maxval=bound)
        return w, b

    # --- primary small case: (batch, seq, channel) = (2, 8, 32), f32 ---
    B, S, C = 2, 8, 32
    x = jax.random.normal(k_x, (B, S, C), dtype=jnp.float32)
    w, b = make_params(C, k_w, k_b)
    out = se_layer(x, w, b)
    jax.block_until_ready(out)
    ref = ref_fn(x, w, b)
    assert out.shape == ref.shape
    assert jnp.allclose(out, ref, atol=1e-5, rtol=1e-5)

    # --- ragged last grid block (M_grp=40, TM=16 -> 3 steps, last one partial) ---
    x2 = jax.random.normal(k_x, (2, 80, C), dtype=jnp.float32)
    out2 = se_layer(x2, w, b)
    jax.block_until_ready(out2)
    assert jnp.allclose(out2, ref_fn(x2, w, b), atol=1e-5, rtol=1e-5)

    # --- channel count not dividing 128 (C=48 -> zero-padded to 64, P=2) ---
    C3 = 48
    w3, b3 = make_params(C3, k_w, k_b)
    x3 = jax.random.normal(k_x, (2, 8, C3), dtype=jnp.float32)
    out3 = se_layer(x3, w3, b3)
    jax.block_until_ready(out3)
    assert jnp.allclose(out3, ref_fn(x3, w3, b3), atol=1e-5, rtol=1e-5)

    # --- bf16 I/O path (halves HBM traffic); accumulation/gating stay f32 ---
    xb = x.astype(jnp.bfloat16)
    outb = se_layer(xb, w, b)
    jax.block_until_ready(outb)
    assert outb.dtype == jnp.bfloat16
    refb = ref_fn(xb.astype(jnp.float32), w, b)
    assert jnp.allclose(outb.astype(jnp.float32), refb, atol=5e-2, rtol=5e-2)

    print("KERNEL_OK")
</pallas_src>

<mosaic_0001>
module attributes {stable_mosaic.version = 11 : i64} {
  func.func @_se_kernel(%arg0: i32, %arg1: memref<8x128xf32, #tpu.memory_space<vmem>>, %arg2: memref<128x128xf32, #tpu.memory_space<vmem>>, %arg3: memref<1x128xf32, #tpu.memory_space<vmem>>, %arg4: memref<8x128xf32, #tpu.memory_space<vmem>>) attributes {dimension_semantics = [#tpu.dimension_semantics<parallel>], iteration_bounds = array<i64: 1>, scalar_prefetch = 0 : i64, scratch_operands = 0 : i64, tpu.core_type = #tpu.core_type<tc>, window_params = [{transform_indices = @transform_0, window_bounds = array<i64: 8, 128>}, {pipeline_mode = #tpu.pipeline_mode<synchronous>, transform_indices = @transform_1, window_bounds = array<i64: 128, 128>}, {pipeline_mode = #tpu.pipeline_mode<synchronous>, transform_indices = @transform_2, window_bounds = array<i64: 1, 128>}, {transform_indices = @transform_3, window_bounds = array<i64: 8, 128>}]} {
    %c0 = arith.constant 0 : index
    %c0_0 = arith.constant 0 : index
    %0 = vector.load %arg1[%c0, %c0_0] : memref<8x128xf32, #tpu.memory_space<vmem>>, vector<8x128xf32>
    %c0_1 = arith.constant 0 : index
    %c0_2 = arith.constant 0 : index
    %1 = vector.load %arg2[%c0_1, %c0_2] : memref<128x128xf32, #tpu.memory_space<vmem>>, vector<128x128xf32>
    %cst = arith.constant dense<0.000000e+00> : vector<8x128xf32>
    %2 = tpu.matmul %0, %1, %cst {dimension_numbers = #tpu.dot_dimension_numbers<[1], [0], [0], [1], [0, 0, 1, 1], [], []>} : vector<8x128xf32>, vector<128x128xf32>, vector<8x128xf32> -> vector<8x128xf32>
    %c0_3 = arith.constant 0 : index
    %c0_4 = arith.constant 0 : index
    %3 = vector.load %arg3[%c0_3, %c0_4] : memref<1x128xf32, #tpu.memory_space<vmem>>, vector<1x128xf32>
    %4 = vector.broadcast %3 : vector<1x128xf32> to vector<8x128xf32>
    %5 = arith.addf %2, %4 : vector<8x128xf32>
    %cst_5 = arith.constant 5.000000e-01 : f32
    %6 = vector.broadcast %cst_5 : f32 to vector<8x128xf32>
    %7 = arith.mulf %6, %5 : vector<8x128xf32>
    %8 = math.tanh %7 : vector<8x128xf32>
    %cst_6 = arith.constant 5.000000e-01 : f32
    %9 = vector.broadcast %cst_6 : f32 to vector<8x128xf32>
    %10 = arith.mulf %9, %8 : vector<8x128xf32>
    %cst_7 = arith.constant 5.000000e-01 : f32
    %11 = vector.broadcast %cst_7 : f32 to vector<8x128xf32>
    %12 = arith.addf %10, %11 : vector<8x128xf32>
    %13 = arith.mulf %0, %12 : vector<8x128xf32>
    %c0_8 = arith.constant 0 : index
    %c0_9 = arith.constant 0 : index
    %14 = vector.load %arg4[%c0_8, %c0_9] : memref<8x128xf32, #tpu.memory_space<vmem>>, vector<8x128xf32>
    tpu.vector_store %arg4[%c0_8, %c0_9], %13 {strides = array<i32>} : memref<8x128xf32, #tpu.memory_space<vmem>>, vector<8x128xf32>,
    return
  }
  func.func @transform_0(%arg0: i32) -> (i32, i32) {
    %c0_i32 = arith.constant 0 : i32
    %c0_i32_0 = arith.constant 0 : i32
    return %arg0, %c0_i32 : i32, i32
  }
  func.func @transform_1(%arg0: i32) -> (i32, i32) {
    %c0_i32 = arith.constant 0 : i32
    %c0_i32_0 = arith.constant 0 : i32
    %c0_i32_1 = arith.constant 0 : i32
    return %c0_i32, %c0_i32_0 : i32, i32
  }
  func.func @transform_2(%arg0: i32) -> (i32, i32) {
    %c0_i32 = arith.constant 0 : i32
    %c0_i32_0 = arith.constant 0 : i32
    %c0_i32_1 = arith.constant 0 : i32
    return %c0_i32, %c0_i32_0 : i32, i32
  }
  func.func @transform_3(%arg0: i32) -> (i32, i32) {
    %c0_i32 = arith.constant 0 : i32
    %c0_i32_0 = arith.constant 0 : i32
    return %arg0, %c0_i32 : i32, i32
  }
}

</mosaic_0001>

<bundles_post_ra>
// kernel: tpu_custom_call.1
= control target key start
LH: loop header
LB: loop body
LE: loop exit
PB: predicated region body
PF: predicated region fallthrough
CT: control target
= control target key end

     0   :  { %8 = vsyncpa [#allocation3], 0  ;;  %s233_s0 = inlined_call_operand.hbm [shape: f32[8,128], index: 0, kind: input, shape index: {}]   ;;  %s234_s1 = inlined_call_operand.hbm [shape: f32[128,128], index: 1, kind: input, shape index: {}]   ;;  %s235_s2 = inlined_call_operand.vmem [shape: f32[1,128], index: 2, kind: input, shape index: {}]   ;;  %s236_s3 = inlined_call_operand.hbm [shape: f32[8,128], index: 3, kind: output, shape index: {}]  }
   0x1   :  { %9 = vsyncpa [#allocation6], 0 }
   0x2   :  { %10 = vsyncpa [#allocation4], 0  ;;  %s16_s14 = sshll.u32 %s233_s0, 4  ;;  %s196_s15 = smov [#allocation2]   ;;  %s17_s14 = int_to_ptr.hbm [resolvable:$true] %s16_s14 }
   0x3   :  { %s18_s16 = sshll.u32 %s196_s15, 4  ;;  %s26_s19 = sshll.u32 %s234_s1, 4  ;;  %s19_s16 = int_to_ptr.vmem [resolvable:$true] %s18_s16  ;;  %s27_s19 = int_to_ptr.hbm [resolvable:$true] %s26_s19 }
   0x4   :  { %21 = dma.hbm_to_vmem [thread:$0]  %s17_s14, 128, %s19_s16, [#allocation3]  }
   0x5   :  { %s197_s20 = smov [#allocation5]   ;;  %s198_s22 = smov 128  }
   0x6   :  { %s28_s21 = sshll.u32 %s197_s20, 4  ;;  %s199_s23 = smov 8   ;;  %s29_s21 = int_to_ptr.vmem [resolvable:$true] %s28_s21 }
   0x7   :  { %34 = dma.hbm_to_vmem [thread:$0]  %s27_s19, 2048, %s29_s21, [#allocation6], %s198_s22, %s198_s22, %s199_s23  }
   0x8   :  { %190 = dma.done.wait [#allocation3], 128  }
   0x9   :  { %191 = vsyncadd [#allocation3], 4294967168 }
   0xa   :  { %192 = dma.done.wait [#allocation6], 2048  }
   0xb   :  { %193 = vsyncadd [#allocation6], 4294965248  ;;  %v61_v0 = vld [vmem:[#allocation5 + $0x78] sm:$0xff]  ;;  %v60_v1 = vld [vmem:[#allocation5 + $0x70] sm:$0xff]  ;;  %s200_s24 = smov [#allocation7]   ;;  %s99_s28 = sshll.u32 %s236_s3, 4  ;;  %s100_s28 = int_to_ptr.hbm [resolvable:$true] %s99_s28 }
   0xc   :  { %66 = vmatpush.msra.mxu0 %v61_v0  ;;  %v59_v2 = vld [vmem:[#allocation5 + $0x68] sm:$0xff]  ;;  %v58_v3 = vld [vmem:[#allocation5 + $0x60] sm:$0xff]  ;;  %v57_v4 = vld [vmem:[#allocation5 + $0x58] sm:$0xff]  ;;  %s97_s25 = sshll.u32 %s200_s24, 4  ;;  %s98_s25 = int_to_ptr.vmem [resolvable:$true] %s97_s25 }
   0xd   :  { %v56_v5 = vld [vmem:[#allocation5 + $0x50] sm:$0xff]  ;;  %v55_v6 = vld [vmem:[#allocation5 + $0x48] sm:$0xff]  ;;  %v54_v7 = vld [vmem:[#allocation5 + $0x40] sm:$0xff] }
   0xe   :  { %67 = vmatpush.msra.mxu0 %v60_v1  ;;  %v53_v8 = vld [vmem:[#allocation5 + $0x38] sm:$0xff]  ;;  %v52_v9 = vld [vmem:[#allocation5 + $0x30] sm:$0xff]  ;;  %v51_v10 = vld [vmem:[#allocation5 + $0x28] sm:$0xff] }
   0xf   :  { %v50_v11 = vld [vmem:[#allocation5 + $0x20] sm:$0xff]  ;;  %v49_v12 = vld [vmem:[#allocation5 + $0x18] sm:$0xff]  ;;  %v48_v13 = vld [vmem:[#allocation5 + $0x10] sm:$0xff] }
  0x10   :  { %68 = vmatpush.msra.mxu0 %v59_v2  ;;  %v47_v14 = vld [vmem:[#allocation5 + $0x8] sm:$0xff]  ;;  %v46_v15 = vld [vmem:[#allocation5] sm:$0xff]  ;;  %v45_v16 = vld [vmem:[#allocation2] sm:$0xff] }
  0x11   :  { %v115_v17 = vld [vmem:[%s235_s2] ss:$0 sm:$0xff] }
  0x12   :  { %69 = vmatpush.msra.mxu0 %v58_v3 }
  0x14   :  { %70 = vmatpush.msra.mxu0 %v57_v4 }
  0x16   :  { %71 = vmatpush.msra.mxu0 %v56_v5 }
  0x18   :  { %72 = vmatpush.msra.mxu0 %v55_v6 }
  0x1a   :  { %73 = vmatpush.msra.mxu0 %v54_v7 }
  0x1c   :  { %74 = vmatpush.msra.mxu0 %v53_v8 }
  0x1e   :  { %75 = vmatpush.msra.mxu0 %v52_v9 }
  0x20   :  { %76 = vmatpush.msra.mxu0 %v51_v10 }
  0x22   :  { %77 = vmatpush.msra.mxu0 %v50_v11 }
  0x24   :  { %78 = vmatpush.msra.mxu0 %v49_v12 }
  0x26   :  { %79 = vmatpush.msra.mxu0 %v48_v13 }
  0x28   :  { %80 = vmatpush.msra.mxu0 %v47_v14 }
  0x2a   :  { %81 = vmatpush.msra.mxu0 %v46_v15 }
  0x2b   :  { %82 = vmatmul.f32.vlgmr.msra.gmra.mxu0 %v45_v16 }
  0xa8   :  { %v83_v18 = vpop.f32.mrf.mxu0 }
  0xa9   :  { %v84_v19 = vadd.f32 %v115_v17, %v83_v18 }
  0xab   :  { %v86_v20 = vmul.f32 0.5, %v84_v19 }
  0xad   :  { %116 = vtanh.f32 %v86_v20 }
  0xb3   :  { %v117_v21 = vpop.eup %116 }
  0xb4   :  { %v88_v22 = vmul.f32 0.5, %v117_v21 }
  0xb6   :  { %v89_v23 = vadd.f32 0.5, %v88_v22 }
  0xb8   :  { %v90_v24 = vmul.f32 %v89_v23, %v45_v16 }
  0xba   :  { %91 = vst [vmem:[#allocation7] sm:$0xff] %v90_v24 }
  0xbb   :  { %102 = dma.vmem_to_hbm [thread:$0]  %s98_s25, 128, %s100_s28, [#allocation4]  }
  0xbc   :  { %194 = dma.done.wait [#allocation4], 128  }
  0xbd   :  { %195 = vsyncadd [#allocation4], 4294967168 }
  0xbe   :  { %107 = vsyncpa [#allocation3], 1 }
  0xbf   :  { %108 = vsyncpa [#allocation6], 1 }
  0xc0   :  { %109 = vsyncpa [#allocation4], 1 }

</bundles_post_ra>
